<compile_context>
chip_gen: v6e
topology: v6e:2x2x1
jax: 0.10.0
libtpu: 0.0.40
codegen_flags: <defaults>
</compile_context>

<pallas_src>
import functools

import jax
import jax.numpy as jnp
from jax.experimental import pallas as pl
from jax.experimental.pallas import tpu as pltpu


def focal_loss_kernel(logits_ref, target_ref, out_ref, *, alpha, gamma, n_rows):
    # (TILE_N, C) block of logits; softmax math always in f32.
    x = logits_ref[...].astype(jnp.float32)
    t = target_ref[...]                               # (TILE_N, 1) int32
    tn, c = x.shape

    # Row max for numerical stability.
    m = jnp.max(x, axis=-1, keepdims=True)            # (TILE_N, 1)

    # Gather the target-class logit directly from x with an iota mask
    # (equivalent to logits[range(N), target] in the PyTorch code).
    # NOTE: out-of-range targets (t < 0 or t >= C) silently select 0 here,
    # unlike torch's gather which would raise.
    class_idx = jax.lax.broadcasted_iota(jnp.int32, (tn, c), 1)
    x_t = jnp.sum(jnp.where(class_idx == t, x, 0.0), axis=-1, keepdims=True)

    # exp / lane-sum; the shifted logits' live range ends at the exp.
    e = jnp.exp(x - m)
    s = jnp.sum(e, axis=-1, keepdims=True)            # (TILE_N, 1), s >= 1

    # ce = -log_softmax[target] = log(sum exp(x - m)) + m - x_t
    ce = jnp.log(s) + (m - x_t)

    # Focal modulation, specialized on the static (Python float) gamma.
    if gamma == 0.0:
        loss = ce                                     # (1 - p)**0 == 1
    else:
        # p_t = softmax[target] recovered exactly as exp(-ce); (TILE_N, 1)
        # transcendental on the otherwise idle EUP slot — no second masked
        # reduction, no divide.
        p_t = jnp.exp(-ce)
        one_m_p = jnp.maximum(1.0 - p_t, 0.0)         # clamp: no NaN in pow
        if gamma == 1.0:
            attn = one_m_p
        elif gamma == 2.0:
            attn = one_m_p * one_m_p
        else:
            attn = one_m_p ** gamma                   # generic fallback
        loss = ce * attn

    loss = alpha * loss                               # (TILE_N, 1)

    # Mask padded rows of the (only possibly partial) last tile by global
    # row index; specialization is static so fully-covered cases pay nothing.
    if n_rows % tn:
        row0 = pl.program_id(0) * tn
        rows = row0 + jax.lax.broadcasted_iota(jnp.int32, (tn, 1), 0)
        loss = jnp.where(rows < n_rows, loss, 0.0)

    # Per-tile partial sum, broadcast into an (8,128)-aligned block so the
    # store is a full, unmasked, lane-dense vst.
    partial = jnp.sum(loss)
    out_ref[...] = jnp.broadcast_to(partial, out_ref.shape).astype(out_ref.dtype)


def _round_up(x, m):
    return ((x + m - 1) // m) * m


def _choose_tile_n(n, c, itemsize):
    """Rows per grid step, sized for the *peak* VMEM footprint of a tile.

    Besides the 2x double-buffered (tile_n, c) input block, Mosaic keeps a
    handful (~5) of tile-sized f32 elementwise temporaries (upcast x, iota,
    select result, e, ...) live, so the budget is applied to that total.
    A ~12 MiB peak fits v5e's 16 MiB scoped-VMEM default; v6e (32 MiB default,
    128 MiB physical) and v7x (32 / 64 MiB) have additional headroom.
    """
    sub = {4: 8, 2: 16, 1: 32}.get(itemsize, 8)       # sublane granule
    n_pad = _round_up(n, sub)

    peak_bytes_per_row = c * (2 * itemsize + 5 * 4)   # 2x input bufs + ~5 f32 temps
    peak_budget = 12 * 1024 * 1024
    rows = max(sub, (peak_budget // max(1, peak_bytes_per_row)) // sub * sub)

    if rows >= n_pad:
        # Whole problem fits in one budget tile.  Still split into up to ~8
        # grid steps so both v7x TensorCores get work and DMA overlaps with
        # compute, but never drop a tile's logits below ~512 KiB so the DMA
        # stays well above the ~0.35 us per-grid-step overhead.
        min_rows = _round_up(pl.cdiv(512 * 1024, max(1, c * itemsize)), sub)
        rows = max(min_rows, _round_up(pl.cdiv(n_pad, 8), sub))
        rows = min(rows, n_pad)
    return rows


def focal_loss(logits, target, alpha=1.0, gamma=0.0):
    """logits: (N, C) float (f32/bf16); target: (N,) int. Returns scalar f32."""
    n, c = logits.shape
    t = target.astype(jnp.int32).reshape(n, 1)
    tile_n = _choose_tile_n(n, c, jnp.dtype(logits.dtype).itemsize)
    num_tiles = pl.cdiv(n, tile_n)

    # One (8,128) f32 block of partial sums per grid step (disjoint blocks
    # keep the grid axis "parallel" so v7x shards it across both cores).
    partials = pl.pallas_call(
        functools.partial(focal_loss_kernel,
                          alpha=float(alpha), gamma=float(gamma), n_rows=n),
        out_shape=jax.ShapeDtypeStruct((num_tiles, 8, 128), jnp.float32),
        grid=(num_tiles,),
        in_specs=[
            pl.BlockSpec((tile_n, c), lambda i: (i, 0)),   # logits tile
            pl.BlockSpec((tile_n, 1), lambda i: (i, 0)),   # target tile
        ],
        out_specs=pl.BlockSpec((1, 8, 128), lambda i: (i, 0, 0)),
        compiler_params=pltpu.CompilerParams(
            dimension_semantics=("parallel",)),
    )(logits, t)

    # One partial per tile lives at [i, 0, 0]; the rest of each block is the
    # same broadcast value (kept only to make the store unmasked).
    return jnp.sum(partials[:, 0, 0]) / jnp.float32(n)


def focal_loss_ref(logits, target, alpha=1.0, gamma=0.0):
    """Pure-JAX reference mirroring the PyTorch module."""
    prob = jax.nn.softmax(logits, axis=-1)
    p_t = prob[jnp.arange(target.shape[0]), target]
    attn = (1.0 - p_t) ** gamma
    logp = jax.nn.log_softmax(logits, axis=1)
    ce = -logp[jnp.arange(target.shape[0]), target]
    return jnp.mean(alpha * ce * attn)


if __name__ == "__main__":
    key = jax.random.PRNGKey(0)
    k_logits, k_target = jax.random.split(key)
    N, C = 8, 16
    logits = jax.random.normal(k_logits, (N, C), dtype=jnp.float32)
    target = jax.random.randint(k_target, (N,), 0, C, dtype=jnp.int32)

    # Module defaults (alpha=1, gamma=0) plus integer and fractional gamma.
    for gamma in (0.0, 2.0, 0.5):
        got = focal_loss(logits, target, alpha=1.0, gamma=gamma)
        jax.block_until_ready(got)
        want = focal_loss_ref(logits, target, alpha=1.0, gamma=gamma)
        assert jnp.allclose(got, want, atol=1e-5, rtol=1e-5), (gamma, got, want)

    # bf16 logits path (no wrapper-side pre-cast; kernel upcasts per tile).
    logits_bf16 = logits.astype(jnp.bfloat16)
    got = focal_loss(logits_bf16, target, alpha=0.25, gamma=2.0)
    jax.block_until_ready(got)
    want = focal_loss_ref(logits_bf16.astype(jnp.float32), target,
                          alpha=0.25, gamma=2.0)
    assert jnp.allclose(got, want, atol=1e-5, rtol=1e-5), (got, want)

    # Batch size not a multiple of the sublane granule (exercises the padded
    # last tile + in-kernel row masking).
    N2 = 21
    logits2 = jax.random.normal(jax.random.PRNGKey(1), (N2, C),
                                dtype=jnp.float32)
    target2 = jax.random.randint(jax.random.PRNGKey(2), (N2,), 0, C,
                                 dtype=jnp.int32)
    got = focal_loss(logits2, target2, alpha=1.0, gamma=2.0)
    jax.block_until_ready(got)
    want = focal_loss_ref(logits2, target2, alpha=1.0, gamma=2.0)
    assert jnp.allclose(got, want, atol=1e-5, rtol=1e-5), (got, want)

    print("KERNEL_OK")
</pallas_src>

<mosaic_0001>
module attributes {stable_mosaic.version = 11 : i64} {
  func.func @focal_loss_kernel(%arg0: i32, %arg1: memref<8x16xf32, #tpu.memory_space<vmem>>, %arg2: memref<8x1xi32, #tpu.memory_space<vmem>>, %arg3: memref<1x8x128xf32, #tpu.memory_space<vmem>>) attributes {dimension_semantics = [#tpu.dimension_semantics<parallel>], iteration_bounds = array<i64: 1>, scalar_prefetch = 0 : i64, scratch_operands = 0 : i64, tpu.core_type = #tpu.core_type<tc>, window_params = [{transform_indices = @transform_0, window_bounds = array<i64: 8, 16>}, {transform_indices = @transform_1, window_bounds = array<i64: 8, 1>}, {transform_indices = @transform_2, window_bounds = array<i64: 1, 8, 128>}]} {
    %c0 = arith.constant 0 : index
    %c0_0 = arith.constant 0 : index
    %0 = vector.load %arg1[%c0, %c0_0] : memref<8x16xf32, #tpu.memory_space<vmem>>, vector<8x16xf32>
    %c0_1 = arith.constant 0 : index
    %c0_2 = arith.constant 0 : index
    %1 = vector.load %arg2[%c0_1, %c0_2] : memref<8x1xi32, #tpu.memory_space<vmem>>, vector<8x1xi32>
    %cst = arith.constant dense<0xFF800000> : vector<8xf32>
    %2 = vector.multi_reduction <maximumf>, %0, %cst [1] : vector<8x16xf32> to vector<8xf32>
    %3 = vector.shape_cast %2 : vector<8xf32> to vector<8x1xf32>
    %4 = tpu.iota {dimensions = array<i32: 1>} : vector<8x16xi32>
    %5 = vector.broadcast %1 : vector<8x1xi32> to vector<8x16xi32>
    %6 = arith.cmpi eq, %4, %5 : vector<8x16xi32>
    %cst_3 = arith.constant 0.000000e+00 : f32
    %7 = vector.broadcast %cst_3 : f32 to vector<8x16xf32>
    %8 = arith.select %6, %0, %7 : vector<8x16xi1>, vector<8x16xf32>
    %cst_4 = arith.constant dense<0.000000e+00> : vector<8xf32>
    %9 = vector.multi_reduction <add>, %8, %cst_4 [1] : vector<8x16xf32> to vector<8xf32>
    %10 = vector.shape_cast %9 : vector<8xf32> to vector<8x1xf32>
    %11 = vector.broadcast %3 : vector<8x1xf32> to vector<8x16xf32>
    %12 = arith.subf %0, %11 : vector<8x16xf32>
    %13 = math.exp %12 : vector<8x16xf32>
    %cst_5 = arith.constant dense<0.000000e+00> : vector<8xf32>
    %14 = vector.multi_reduction <add>, %13, %cst_5 [1] : vector<8x16xf32> to vector<8xf32>
    %15 = vector.shape_cast %14 : vector<8xf32> to vector<8x1xf32>
    %16 = math.log %15 : vector<8x1xf32>
    %17 = arith.subf %3, %10 : vector<8x1xf32>
    %18 = arith.addf %16, %17 : vector<8x1xf32>
    %cst_6 = arith.constant 1.000000e+00 : f32
    %19 = vector.broadcast %cst_6 : f32 to vector<8x1xf32>
    %20 = arith.mulf %19, %18 : vector<8x1xf32>
    %21 = vector.shape_cast %20 : vector<8x1xf32> to vector<1x8x1xf32>
    %cst_7 = arith.constant dense<0.000000e+00> : vector<1xf32>
    %22 = vector.multi_reduction <add>, %21, %cst_7 [1, 2] : vector<1x8x1xf32> to vector<1xf32>
    %23 = vector.shape_cast %22 : vector<1xf32> to vector<1x1x1xf32>
    %24 = vector.extract %23[0, 0, 0] : f32 from vector<1x1x1xf32>
    %25 = vector.broadcast %24 : f32 to vector<1x8x128xf32>
    %c0_8 = arith.constant 0 : index
    %c0_9 = arith.constant 0 : index
    %c0_10 = arith.constant 0 : index
    %26 = vector.load %arg3[%c0_8, %c0_9, %c0_10] : memref<1x8x128xf32, #tpu.memory_space<vmem>>, vector<1x8x128xf32>
    tpu.vector_store %arg3[%c0_8, %c0_9, %c0_10], %25 {strides = array<i32>} : memref<1x8x128xf32, #tpu.memory_space<vmem>>, vector<1x8x128xf32>,
    return
  }
  func.func @transform_0(%arg0: i32) -> (i32, i32) {
    %c0_i32 = arith.constant 0 : i32
    %c0_i32_0 = arith.constant 0 : i32
    return %arg0, %c0_i32 : i32, i32
  }
  func.func @transform_1(%arg0: i32) -> (i32, i32) {
    %c0_i32 = arith.constant 0 : i32
    %c0_i32_0 = arith.constant 0 : i32
    return %arg0, %c0_i32 : i32, i32
  }
  func.func @transform_2(%arg0: i32) -> (i32, i32, i32) {
    %c0_i32 = arith.constant 0 : i32
    %c0_i32_0 = arith.constant 0 : i32
    %c0_i32_1 = arith.constant 0 : i32
    return %arg0, %c0_i32, %c0_i32_0 : i32, i32, i32
  }
}

</mosaic_0001>

<bundles_post_ra>
// kernel: tpu_custom_call.1
= control target key start
LH: loop header
LB: loop body
LE: loop exit
PB: predicated region body
PF: predicated region fallthrough
CT: control target
= control target key end

     0   :  { %vm14_vm0 = vcmask 130048   ;;  %s125_s0 = inlined_call_operand.vmem [shape: f32[8,16], index: 0, kind: input, shape index: {}]   ;;  %s126_s1 = inlined_call_operand.vmem [shape: s32[8,1], index: 1, kind: input, shape index: {}]   ;;  %s127_s2 = inlined_call_operand.hbm [shape: f32[1,8,128], index: 2, kind: output, shape index: {}]  }
   0x1   :  { %v12_v0 = vld [vmem:[%s125_s0] sm:$0xff] }
   0x2   :  { %7 = vsyncpa [#allocation3], 0  ;;  %v15_v1 = vsel %vm14_vm0, %v12_v0, -inf  ;;  %v96_v2 = vmov 0   ;;  %v13_v3 = vld [vmem:[%s126_s1] sm:$0xff]  ;;  %v18_v7 = vlaneseq  ;;  %vm38_vm2 = vcmask 7168  }
   0x3   :  { %69 = vset.pattern.permute.xlu0 %v96_v2  ;;  %s97_s0 = smov [#allocation2]  }
   0x4   :  { %16 = vmax.xlane.f32.xlu0 %v15_v1  ;;  %v19_v8 = vand.u32 127, %v18_v7  ;;  %s57_s1 = sshll.u32 %s97_s0, 4  ;;  %s58_s1 = int_to_ptr.vmem [resolvable:$true] %s57_s1 }
   0x5   :  { %s74_s14 = scalar_lea.vmem %s58_s1, 128  ;;  %p79_p1 = scmp.lt.s32.totalorder %s58_s1, %s58_s1 }
   0x6   :  { %p75_p0 = scmp.ne.s32.totalorder %s58_s1, %s74_s14  ;;  %p80_p2 = scmp.lt.s32.totalorder %s74_s14, %s74_s14 }
   0x8   :  { %p81_p3 = por %p80_p2, %p79_p1 }
   0xa   :  { %p82_p4 = pnand %p81_p3, %p75_p0 }
  0x1a   :  { %21 = vperm.xlu0 %69, %v13_v3  }
  0x8d   :  { %v17_v4 = vpop.xlane.xlu0 %16 }
  0x8e   :  { %v28_v5 = vsub.f32 %v12_v0, %v17_v4 }
  0x90   :  { %v29_v6 = vmul.f32 1.442695, %v28_v5 }
  0x92   :  { %70 = vpow2.f32 %v29_v6 }
  0x95   :  { %v22_v9 = vpop.permute.xlu0 %21 }
  0x96   :  { %vm23_vm1 = vcmp.eq.s32.totalorder %v19_v8, %v22_v9 }
  0x97   :  { %v24_v11 = vsel %vm23_vm1, %v12_v0, 0.0 }
  0x98   :  { %v25_v13 = vsel %vm14_vm0, %v24_v11, 0.0 }
  0x9f   :  { %v71_v10 = vpop.eup %70 }
  0xa0   :  { %v31_v12 = vsel %vm14_vm0, %v71_v10, 0.0 }
  0xa1   :  { %32 = vadd.xlane.f32.xlu1 %v31_v12 }
  0xa5   :  { %26 = vadd.xlane.f32.xlu1 %v25_v13 }
 0x12a   :  { %v33_v14 = vpop.xlane.xlu1 %32 }
 0x12b   :  { %72 = vlog2.f32 %v33_v14 }
 0x12e   :  { %v27_v15 = vpop.xlane.xlu1 %26 }
 0x12f   :  { %v36_v18 = vsub.f32 %v17_v4, %v27_v15 }
 0x138   :  { %v73_v16 = vpop.eup %72 }
 0x139   :  { %v35_v17 = vmul.f32 0.6931472, %v73_v16 }
 0x13b   :  { %v37_v19 = vadd.f32 %v36_v18, %v35_v17 }
 0x13d   :  { %v39_v20 = vsel %vm38_vm2, %v37_v19, 0.0 }
 0x13e   :  { %40 = vadd.xlane.f32.xlu1 %v39_v20 }
 0x1c7   :  { %v41_v21 = vpop.xlane.xlu1 %40 }
 0x1c8   :  { %v42_v22 = vrot.slane %v41_v21, 4 }
 0x1ca   :  { %v43_v23 = vadd.f32 %v42_v22, %v41_v21 }
 0x1cc   :  { %v44_v24 = vrot.slane %v43_v23, 2 }
 0x1ce   :  { %v45_v25 = vadd.f32 %v44_v24, %v43_v23 }
 0x1d0   :  { %v46_v26 = vrot.slane %v45_v25, 1 }
 0x1d2   :  { %v47_v27 = vadd.f32 %v46_v26, %v45_v25 }
 0x1d4   :  { %65 = vpush %v47_v27 }
 0x205   :  { %s66_s13 = spop %65 }
 0x206   :  { %v49_v28 = vstv %s66_s13 }
 0x207   :  { %50 = vst [vmem:[#allocation2] sm:$0xff] %v49_v28 }
 0x208   :  { %85 = shalt.err (!%p82_p4)
}
 0x209   :  { %60 = dma.vmem_to_hbm [thread:$0]  %s58_s1, 128, %s127_s2, [#allocation3]  }
 0x20a   :  { %94 = dma.done.wait [#allocation3], 128  }
 0x20b   :  { %95 = vsyncadd [#allocation3], 4294967168 }
 0x20c   :  { %64 = vsyncpa [#allocation3], 1 }

</bundles_post_ra>
